<compile_context>
chip_gen: v5e
topology: v5e:2x2
jax: 0.10.0
libtpu: 0.0.40
codegen_flags: <defaults>
</compile_context>

<pallas_src>
import jax
import jax.numpy as jnp
from jax.experimental import pallas as pl

B, SEQ_LEN, N_NODES, NUM_FEATS, HIDDEN = 2, 8, 16, 4, 32


# ----------------------------- Pallas kernel ---------------------------------
def _tsin_fused_kernel(x_ref, wsblk_ref, adjb_ref, wtmap_ref, ssum_ref,
                       woblk_ref, o_ref):
    """Whole Predictor.forward in a single (grid-less) invocation.

    x_ref     : (B*T*N, 2F)    f32   raw features, rows=(b,t,n), cols=(modality,f)
    wsblk_ref : (2F, 2H)       bf16  block_diag(ws_taxi, ws_ride)   spatial transform
    adjb_ref  : (B*T*N, B*T*N) bf16  kron(eye(B*T), adj)            batched graph conv
    wtmap_ref : (B*T*N, 2H)    f32   wt[m, t] broadcast over (b,n,h) temporal weights
    ssum_ref  : (B*N, B*T*N)   bf16  0/1 sum-over-t selection matrix
    woblk_ref : (2H, 2F)       bf16  block_diag(wo_taxi, wo_ride)   output projection
    o_ref     : (B*N, 2F)      f32   rows=(b,n), cols=(modality,f)
    """
    f32 = jnp.float32
    bf16 = jnp.bfloat16
    # Spatial feature transform Ws, both modalities in one MXU push.
    h = jnp.dot(x_ref[...].astype(bf16), wsblk_ref[...],
                preferred_element_type=f32)                          # (BTN, 2H)
    # Graph convolution, batched over (b, t) via block-diagonal adjacency.
    z = jnp.dot(adjb_ref[...], h.astype(bf16),
                preferred_element_type=f32)                          # (BTN, 2H)
    # ReLU + learned temporal weighting: f32 element-wise on the VPU.
    r = jnp.maximum(z, 0.0) * wtmap_ref[...]                         # (BTN, 2H)
    # Sum over seq_len (matmul with a 0/1 selection matrix -> stays on the MXU).
    g = jnp.dot(ssum_ref[...], r.astype(bf16),
                preferred_element_type=f32)                          # (BN, 2H)
    # Output projection Wo, both modalities in one MXU push.
    o_ref[...] = jnp.dot(g.astype(bf16), woblk_ref[...],
                         preferred_element_type=f32)                 # (BN, 2F)


# ------------------- parameter-derived constants (built once) ----------------
def _block_diag2(a, b):
    (ra, ca), (rb, cb) = a.shape, b.shape
    top = jnp.concatenate([a, jnp.zeros((ra, cb), a.dtype)], axis=1)
    bot = jnp.concatenate([jnp.zeros((rb, ca), b.dtype), b], axis=1)
    return jnp.concatenate([top, bot], axis=0)


def prepare_operands(params):
    """Built ONCE per parameter set, outside the per-call forward path."""
    F, H, T, N = NUM_FEATS, HIDDEN, SEQ_LEN, N_NODES
    f32, bf16 = jnp.float32, jnp.bfloat16
    ws_blk = _block_diag2(params["ws_taxi"], params["ws_ride"]).astype(bf16)  # (2F, 2H)
    wo_blk = _block_diag2(params["wo_taxi"], params["wo_ride"]).astype(bf16)  # (2H, 2F)
    adj_big = jnp.kron(jnp.eye(B * T, dtype=f32), params["adj"]).astype(bf16)  # (BTN, BTN)
    s_sum = jnp.kron(
        jnp.eye(B, dtype=f32),
        jnp.kron(jnp.ones((1, T), f32), jnp.eye(N, dtype=f32))).astype(bf16)   # (BN, BTN)
    wt = jnp.stack([params["wt_taxi"], params["wt_ride"]], axis=0)             # (2, T)
    wt_map = jnp.broadcast_to(
        wt.T[None, :, None, :, None],
        (B, T, N, 2, H)).reshape(B * T * N, 2 * H).astype(f32)                 # (BTN, 2H)
    return {"ws_blk": ws_blk, "wo_blk": wo_blk, "adj_big": adj_big,
            "s_sum": s_sum, "wt_map": wt_map}


# ----------------------------- forward wrapper -------------------------------
@jax.jit
def predictor_forward(x, ops):
    """x: (B, T, N, 2F) -> (taxi_pred, ride_pred), each (B, N, F)."""
    Bx, T, N, F2 = x.shape
    F = F2 // 2
    x2d = x.reshape(Bx * T * N, F2)        # contiguous collapse: no data movement
    out2d = pl.pallas_call(
        _tsin_fused_kernel,
        out_shape=jax.ShapeDtypeStruct((Bx * N, F2), jnp.float32),
    )(x2d, ops["ws_blk"], ops["adj_big"], ops["wt_map"], ops["s_sum"],
      ops["wo_blk"])
    out = out2d.reshape(Bx, N, 2, F)
    return out[:, :, 0, :], out[:, :, 1, :]


# ---------------- deterministic parameter init (mirrors network_init) --------
def _xavier_uniform(key, shape):
    fan_in, fan_out = shape[0], shape[1]
    limit = (6.0 / (fan_in + fan_out)) ** 0.5
    return jax.random.uniform(key, shape, jnp.float32, -limit, limit)


def init_params(key, n_nodes, num_feats, hidden):
    ks = jax.random.split(key, 8)
    # predefined adjacency: row-normalized deterministic random graph
    a = jax.random.uniform(ks[0], (n_nodes, n_nodes), jnp.float32)
    a = a + jnp.eye(n_nodes, dtype=jnp.float32)
    adj = a / jnp.sum(a, axis=-1, keepdims=True)
    return {
        "adj": adj,
        # dim > 1 -> xavier_uniform, dim == 1 -> uniform [0, 1)
        "ws_taxi": _xavier_uniform(ks[1], (num_feats, hidden)),
        "wo_taxi": _xavier_uniform(ks[2], (hidden, num_feats)),
        "wt_taxi": jax.random.uniform(ks[3], (SEQ_LEN,), jnp.float32),
        "ws_ride": _xavier_uniform(ks[4], (num_feats, hidden)),
        "wo_ride": _xavier_uniform(ks[5], (hidden, num_feats)),
        "wt_ride": jax.random.uniform(ks[6], (SEQ_LEN,), jnp.float32),
    }


# ---------------- references for correctness checks --------------------------
def _ref_branch(x_mod, adj, w_t, w_s, w_o):
    """Pure-f32 HIGHEST-precision reference of the surrogate semantics."""
    hi = jax.lax.Precision.HIGHEST
    z = jnp.einsum("nm,btmf->btnf", adj, x_mod, precision=hi)
    z = jnp.maximum(jnp.einsum("btnf,fh->btnh", z, w_s, precision=hi), 0.0)
    z = jnp.einsum("t,btnh->bnh", w_t, z, precision=hi)
    return jnp.einsum("bnh,hf->bnf", z, w_o, precision=hi)


def _staged_ref(x, ops):
    """jnp reference with the exact same bf16-operand / f32-accum numerics."""
    f32, bf16 = jnp.float32, jnp.bfloat16
    Bx, T, N, F2 = x.shape
    x2d = x.reshape(Bx * T * N, F2).astype(bf16)
    h = jnp.dot(x2d, ops["ws_blk"], preferred_element_type=f32)
    z = jnp.dot(ops["adj_big"], h.astype(bf16), preferred_element_type=f32)
    r = jnp.maximum(z, 0.0) * ops["wt_map"]
    g = jnp.dot(ops["s_sum"], r.astype(bf16), preferred_element_type=f32)
    out2d = jnp.dot(g.astype(bf16), ops["wo_blk"], preferred_element_type=f32)
    out = out2d.reshape(Bx, N, 2, F2 // 2)
    return out[:, :, 0, :], out[:, :, 1, :]


if __name__ == "__main__":
    key = jax.random.PRNGKey(0)
    k_x, k_p = jax.random.split(key)
    x = jax.random.normal(k_x, (B, SEQ_LEN, N_NODES, 2 * NUM_FEATS), jnp.float32)
    params = init_params(k_p, N_NODES, NUM_FEATS, HIDDEN)
    ops = prepare_operands(params)          # once per parameter set (hoisted)

    taxi_pred, ride_pred = predictor_forward(x, ops)
    jax.block_until_ready((taxi_pred, ride_pred))

    assert taxi_pred.shape == (B, N_NODES, NUM_FEATS)
    assert ride_pred.shape == (B, N_NODES, NUM_FEATS)

    # (1) Tight check against a jnp reference using identical bf16 operand
    #     quantization and f32 accumulation (verifies the Pallas mechanics).
    taxi_st, ride_st = _staged_ref(x, ops)
    assert jnp.allclose(taxi_pred, taxi_st, atol=1e-3, rtol=1e-3)
    assert jnp.allclose(ride_pred, ride_st, atol=1e-3, rtol=1e-3)

    # (2) Semantic check against the pure-f32 reference; tolerance reflects the
    #     deliberate bf16 MXU-operand quantization (review item for v6e/v7x).
    F = NUM_FEATS
    taxi_ref = _ref_branch(x[..., :F], params["adj"], params["wt_taxi"],
                           params["ws_taxi"], params["wo_taxi"])
    ride_ref = _ref_branch(x[..., F:], params["adj"], params["wt_ride"],
                           params["ws_ride"], params["wo_ride"])
    assert jnp.allclose(taxi_pred, taxi_ref, atol=3e-2, rtol=3e-2)
    assert jnp.allclose(ride_pred, ride_ref, atol=3e-2, rtol=3e-2)

    print("KERNEL_OK")
</pallas_src>

<mosaic_0001>
module attributes {stable_mosaic.version = 11 : i64} {
  func.func @_tsin_fused_kernel(%arg0: memref<256x8xf32, #tpu.memory_space<vmem>>, %arg1: memref<8x64xbf16, #tpu.memory_space<vmem>>, %arg2: memref<256x256xbf16, #tpu.memory_space<vmem>>, %arg3: memref<256x64xf32, #tpu.memory_space<vmem>>, %arg4: memref<32x256xbf16, #tpu.memory_space<vmem>>, %arg5: memref<64x8xbf16, #tpu.memory_space<vmem>>, %arg6: memref<32x8xf32, #tpu.memory_space<vmem>>) attributes {dimension_semantics = [], scalar_prefetch = 0 : i64, scratch_operands = 0 : i64, tpu.core_type = #tpu.core_type<tc>} {
    %c0 = arith.constant 0 : index
    %c0_0 = arith.constant 0 : index
    %0 = vector.load %arg0[%c0, %c0_0] : memref<256x8xf32, #tpu.memory_space<vmem>>, vector<256x8xf32>
    %1 = arith.truncf %0 : vector<256x8xf32> to vector<256x8xbf16>
    %c0_1 = arith.constant 0 : index
    %c0_2 = arith.constant 0 : index
    %2 = vector.load %arg1[%c0_1, %c0_2] : memref<8x64xbf16, #tpu.memory_space<vmem>>, vector<8x64xbf16>
    %cst = arith.constant dense<0.000000e+00> : vector<256x64xf32>
    %3 = tpu.matmul %1, %2, %cst {dimension_numbers = #tpu.dot_dimension_numbers<[1], [0], [0], [1], [0, 0, 1, 1], [], []>} : vector<256x8xbf16>, vector<8x64xbf16>, vector<256x64xf32> -> vector<256x64xf32>
    %c0_3 = arith.constant 0 : index
    %c0_4 = arith.constant 0 : index
    %4 = vector.load %arg2[%c0_3, %c0_4] : memref<256x256xbf16, #tpu.memory_space<vmem>>, vector<256x256xbf16>
    %5 = arith.truncf %3 : vector<256x64xf32> to vector<256x64xbf16>
    %cst_5 = arith.constant dense<0.000000e+00> : vector<256x64xf32>
    %6 = tpu.matmul %4, %5, %cst_5 {dimension_numbers = #tpu.dot_dimension_numbers<[1], [0], [0], [1], [0, 0, 1, 1], [], []>} : vector<256x256xbf16>, vector<256x64xbf16>, vector<256x64xf32> -> vector<256x64xf32>
    %cst_6 = arith.constant 0.000000e+00 : f32
    %7 = vector.broadcast %cst_6 : f32 to vector<256x64xf32>
    %8 = arith.maximumf %6, %7 : vector<256x64xf32>
    %c0_7 = arith.constant 0 : index
    %c0_8 = arith.constant 0 : index
    %9 = vector.load %arg3[%c0_7, %c0_8] : memref<256x64xf32, #tpu.memory_space<vmem>>, vector<256x64xf32>
    %10 = arith.mulf %8, %9 : vector<256x64xf32>
    %c0_9 = arith.constant 0 : index
    %c0_10 = arith.constant 0 : index
    %11 = vector.load %arg4[%c0_9, %c0_10] : memref<32x256xbf16, #tpu.memory_space<vmem>>, vector<32x256xbf16>
    %12 = arith.truncf %10 : vector<256x64xf32> to vector<256x64xbf16>
    %cst_11 = arith.constant dense<0.000000e+00> : vector<32x64xf32>
    %13 = tpu.matmul %11, %12, %cst_11 {dimension_numbers = #tpu.dot_dimension_numbers<[1], [0], [0], [1], [0, 0, 1, 1], [], []>} : vector<32x256xbf16>, vector<256x64xbf16>, vector<32x64xf32> -> vector<32x64xf32>
    %14 = arith.truncf %13 : vector<32x64xf32> to vector<32x64xbf16>
    %c0_12 = arith.constant 0 : index
    %c0_13 = arith.constant 0 : index
    %15 = vector.load %arg5[%c0_12, %c0_13] : memref<64x8xbf16, #tpu.memory_space<vmem>>, vector<64x8xbf16>
    %cst_14 = arith.constant dense<0.000000e+00> : vector<32x8xf32>
    %16 = tpu.matmul %14, %15, %cst_14 {dimension_numbers = #tpu.dot_dimension_numbers<[1], [0], [0], [1], [0, 0, 1, 1], [], []>} : vector<32x64xbf16>, vector<64x8xbf16>, vector<32x8xf32> -> vector<32x8xf32>
    %c0_15 = arith.constant 0 : index
    %c0_16 = arith.constant 0 : index
    %17 = vector.load %arg6[%c0_15, %c0_16] : memref<32x8xf32, #tpu.memory_space<vmem>>, vector<32x8xf32>
    tpu.vector_store %arg6[%c0_15, %c0_16], %16 {strides = array<i32>} : memref<32x8xf32, #tpu.memory_space<vmem>>, vector<32x8xf32>,
    return
  }
}

</mosaic_0001>

<bundles_post_ra>
// kernel: predictor_forward.1
= control target key start
LH: loop header
LB: loop body
LE: loop exit
PB: predicated region body
PF: predicated region fallthrough
CT: control target
= control target key end

     0   :  { %vm122_vm0 = vcmask 1043456   ;;  %vm73_vm1 = vcmask 64512   ;;  %vm809_vm2 = vcmask 523264   ;;  %s1643_s1 = inlined_call_operand.vmem [shape: bf16[8,64], index: 1, kind: input, shape index: {}]   ;;  %s1644_s0 = inlined_call_operand.vmem [shape: f32[256,8], index: 0, kind: input, shape index: {}]   ;;  %s1645_s2 = inlined_call_operand.vmem [shape: bf16[256,256], index: 2, kind: input, shape index: {}]   ;;  %s1646_s3 = inlined_call_operand.vmem [shape: f32[256,64], index: 3, kind: input, shape index: {}]   ;;  %s1647_s4 = inlined_call_operand.vmem [shape: bf16[32,256], index: 4, kind: input, shape index: {}]   ;;  %s1648_s5 = inlined_call_operand.vmem [shape: bf16[64,8], index: 5, kind: input, shape index: {}]   ;;  %s1649_s6 = inlined_call_operand.vmem [shape: f32[32,8], index: 6, kind: output, shape index: {}]  }
   0x1   :  { %v72_v0 = vld [vmem:[%s1643_s1] sm:$0xf]  ;;  %v25_v2 = vld [vmem:[%s1644_s0 + $0x8] sm:$0xff]  ;;  %v26_v5 = vld [vmem:[%s1644_s0 + $0x10] sm:$0xff] }
   0x2   :  { %v24_v1 = vld [vmem:[%s1644_s0] sm:$0xff]  ;;  %v124_v3 = vsel %vm122_vm0, %v72_v0, 0  ;;  %v27_v6 = vld [vmem:[%s1644_s0 + $0x18] sm:$0xff]  ;;  %v29_v9 = vld [vmem:[%s1644_s0 + $0x28] sm:$0xff] }
   0x3   :  { %v56_v4 = vpack.c.bf16 %v25_v2, %v24_v1  ;;  %133 = vmatpush.bf16.msra.mxu0 %v124_v3  ;;  %v57_v7 = vpack.c.bf16 %v27_v6, %v26_v5  ;;  %v28_v8 = vld [vmem:[%s1644_s0 + $0x20] sm:$0xff]  ;;  %v30_v11 = vld [vmem:[%s1644_s0 + $0x30] sm:$0xff]  ;;  %v31_v12 = vld [vmem:[%s1644_s0 + $0x38] sm:$0xff] }
   0x4   :  { %v58_v10 = vpack.c.bf16 %v29_v9, %v28_v8  ;;  %v59_v13 = vpack.c.bf16 %v31_v12, %v30_v11  ;;  %v32_v14 = vld [vmem:[%s1644_s0 + $0x40] sm:$0xff]  ;;  %v33_v15 = vld [vmem:[%s1644_s0 + $0x48] sm:$0xff]  ;;  %v34_v17 = vld [vmem:[%s1644_s0 + $0x50] sm:$0xff] }
   0x5   :  { %v60_v16 = vpack.c.bf16 %v33_v15, %v32_v14  ;;  %v35_v18 = vld [vmem:[%s1644_s0 + $0x58] sm:$0xff]  ;;  %v36_v20 = vld [vmem:[%s1644_s0 + $0x60] sm:$0xff]  ;;  %v37_v21 = vld [vmem:[%s1644_s0 + $0x68] sm:$0xff] }
   0x6   :  { %843 = vmatmul.msk.bf16.vlgmr.msra.gmra.mxu0 %vm73_vm1, %v56_v4  ;;  %v61_v19 = vpack.c.bf16 %v35_v18, %v34_v17  ;;  %v62_v22 = vpack.c.bf16 %v37_v21, %v36_v20  ;;  %v38_v23 = vld [vmem:[%s1644_s0 + $0x70] sm:$0xff]  ;;  %v39_v24 = vld [vmem:[%s1644_s0 + $0x78] sm:$0xff]  ;;  %v40_v26 = vld [vmem:[%s1644_s0 + $0x80] sm:$0xff] }
   0x7   :  { %v63_v25 = vpack.c.bf16 %v39_v24, %v38_v23  ;;  %v41_v27 = vld [vmem:[%s1644_s0 + $0x88] sm:$0xff]  ;;  %v42_v32 = vld [vmem:[%s1644_s0 + $0x90] sm:$0xff]  ;;  %v43_v33 = vld [vmem:[%s1644_s0 + $0x98] sm:$0xff] }
   0x8   :  { %v64_v28 = vpack.c.bf16 %v41_v27, %v40_v26  ;;  %v65_v34 = vpack.c.bf16 %v43_v33, %v42_v32  ;;  %v44_v38 = vld [vmem:[%s1644_s0 + $0xa0] sm:$0xff]  ;;  %v45_v39 = vld [vmem:[%s1644_s0 + $0xa8] sm:$0xff]  ;;  %v46_v44 = vld [vmem:[%s1644_s0 + $0xb0] sm:$0xff] }
   0x9   :  { %v66_v40 = vpack.c.bf16 %v45_v39, %v44_v38  ;;  %v47_v45 = vld [vmem:[%s1644_s0 + $0xb8] sm:$0xff]  ;;  %v48_v50 = vld [vmem:[%s1644_s0 + $0xc0] sm:$0xff]  ;;  %v49_v51 = vld [vmem:[%s1644_s0 + $0xc8] sm:$0xff] }
   0xa   :  { %v67_v46 = vpack.c.bf16 %v47_v45, %v46_v44  ;;  %v68_v52 = vpack.c.bf16 %v49_v51, %v48_v50  ;;  %v50_v55 = vld [vmem:[%s1644_s0 + $0xd0] sm:$0xff]  ;;  %v51_v56 = vld [vmem:[%s1644_s0 + $0xd8] sm:$0xff]  ;;  %v52_v60 = vld [vmem:[%s1644_s0 + $0xe0] sm:$0xff] }
   0xb   :  { %v69_v57 = vpack.c.bf16 %v51_v56, %v50_v55  ;;  %v53_v61 = vld [vmem:[%s1644_s0 + $0xe8] sm:$0xff]  ;;  %v54_v1 = vld [vmem:[%s1644_s0 + $0xf0] sm:$0xff]  ;;  %v55_v2 = vld [vmem:[%s1644_s0 + $0xf8] sm:$0xff] }
   0xc   :  { %v70_v62 = vpack.c.bf16 %v53_v61, %v52_v60  ;;  %v71_v3 = vpack.c.bf16 %v55_v2, %v54_v1  ;;  %v879_v55 = vld [vmem:[%s1645_s2 + $0x28] sm:$0xf0]  ;;  %v1027_v60 = vld [vmem:[%s1645_s2 + $0x34] sm:$0xf]  ;;  %v887_v61 = vld [vmem:[%s1645_s2 + $0x38] sm:$0xf0] }
   0xd   :  { %v1050_v1 = vld [vmem:[%s1645_s2 + $0xe4] sm:$0xf0] }
  0x16   :  { %844 = vmatmul.msk.bf16.gmra.mxu0 %vm73_vm1, %v57_v7 }
  0x26   :  { %845 = vmatmul.msk.bf16.gmra.mxu0 %vm73_vm1, %v58_v10 }
  0x36   :  { %846 = vmatmul.msk.bf16.gmra.mxu0 %vm73_vm1, %v59_v13 }
  0x46   :  { %847 = vmatmul.msk.bf16.gmra.mxu0 %vm73_vm1, %v60_v16 }
  0x56   :  { %848 = vmatmul.msk.bf16.gmra.mxu0 %vm73_vm1, %v61_v19 }
  0x66   :  { %849 = vmatmul.msk.bf16.gmra.mxu0 %vm73_vm1, %v62_v22 }
  0x76   :  { %850 = vmatmul.msk.bf16.gmra.mxu0 %vm73_vm1, %v63_v25 }
  0x83   :  { %v135_v29 = vpop.f32.mrf.mxu0 }
  0x86   :  { %851 = vmatmul.msk.bf16.gmra.mxu0 %vm73_vm1, %v64_v28 }
  0x8b   :  { %v137_v30 = vpop.f32.mrf.mxu0 }
  0x8c   :  { %v1178_v31 = vpack.c.bf16 %v137_v30, %v135_v29  ;;  %v861_v29 = vld [vmem:[%s1645_s2] sm:$0xf]  ;;  %v1022_v30 = vld [vmem:[%s1645_s2 + $0x4] sm:$0xf0] }
  0x93   :  { %v140_v35 = vpop.f32.mrf.mxu0 }
  0x96   :  { %852 = vmatmul.msk.bf16.gmra.mxu0 %vm73_vm1, %v65_v34 }
  0x9b   :  { %v142_v36 = vpop.f32.mrf.mxu0 }
  0x9c   :  { %v248_v37 = vpack.c.bf16 %v142_v36, %v140_v35  ;;  %v869_v36 = vld [vmem:[%s1645_s2 + $0x10] sm:$0xf] }
  0xa3   :  { %v145_v41 = vpop.f32.mrf.mxu0 }
  0xa6   :  { %853 = vmatmul.msk.bf16.gmra.mxu0 %vm73_vm1, %v66_v40  ;;  %v877_v40 = vld [vmem:[%s1645_s2 + $0x20] sm:$0xf] }
  0xab   :  { %v147_v42 = vpop.f32.mrf.mxu0 }
  0xac   :  { %v249_v43 = vpack.c.bf16 %v147_v42, %v145_v41  ;;  %v1026_v41 = vld [vmem:[%s1645_s2 + $0x24] sm:$0xf0]  ;;  %v1021_v42 = vld [vmem:[%s1645_s2 + $0x4] sm:$0xf] }
  0xad   :  { %v878_v44 = vor.u32 %v1026_v41, %v877_v40  ;;  %v1037_v40 = vld [vmem:[%s1645_s2 + $0x84] sm:$0xf]  ;;  %v927_v41 = vld [vmem:[%s1645_s2 + $0x88] sm:$0xf0] }
  0xb3   :  { %v150_v47 = vpop.f32.mrf.mxu0 }
  0xb6   :  { %854 = vmatmul.msk.bf16.gmra.mxu0 %vm73_vm1, %v67_v46  ;;  %v885_v46 = vld [vmem:[%s1645_s2 + $0x30] sm:$0xf] }
  0xbb   :  { %v152_v48 = vpop.f32.mrf.mxu0 }
  0xbc   :  { %v250_v49 = vpack.c.bf16 %v152_v48, %v150_v47  ;;  %v1028_v47 = vld [vmem:[%s1645_s2 + $0x34] sm:$0xf0]  ;;  %v1023_v48 = vld [vmem:[%s1645_s2 + $0x14] sm:$0xf] }
  0xbd   :  { %v886_v50 = vor.u32 %v1028_v47, %v885_v46 }
  0xc3   :  { %v155_v53 = vpop.f32.mrf.mxu0 }
  0xc6   :  { %855 = vmatmul.msk.bf16.gmra.mxu0 %vm73_vm1, %v68_v52  ;;  %v893_v52 = vld [vmem:[%s1645_s2 + $0x40] sm:$0xf] }
  0xcb   :  { %v157_v54 = vpop.f32.mrf.mxu0 }
  0xcc   :  { %v251_v10 = vpack.c.bf16 %v157_v54, %v155_v53  ;;  %v1030_v53 = vld [vmem:[%s1645_s2 + $0x44] sm:$0xf0]  ;;  %v1025_v54 = vld [vmem:[%s1645_s2 + $0x24] sm:$0xf] }
  0xcd   :  { %v894_v56 = vor.u32 %v1030_v53, %v893_v52 }
  0xd3   :  { %v160_v58 = vpop.f32.mrf.mxu0 }
  0xd6   :  { %856 = vmatmul.msk.bf16.gmra.mxu0 %vm73_vm1, %v69_v57  ;;  %v882_v57 = vor.u32 %v1025_v54, %v879_v55  ;;  %v949_v54 = vld [vmem:[%s1645_s2 + $0xb0] sm:$0xf]  ;;  %v1044_v55 = vld [vmem:[%s1645_s2 + $0xb4] sm:$0xf0] }
  0xdb   :  { %v162_v59 = vpop.f32.mrf.mxu0 }
  0xdc   :  { %v252_v9 = vpack.c.bf16 %v162_v59, %v160_v58  ;;  %v901_v58 = vld [vmem:[%s1645_s2 + $0x50] sm:$0xf]  ;;  %v1032_v59 = vld [vmem:[%s1645_s2 + $0x54] sm:$0xf0] }
  0xe3   :  { %v165_v63 = vpop.f32.mrf.mxu0 }
  0xe6   :  { %857 = vmatmul.msk.bf16.gmra.mxu0 %vm73_vm1, %v70_v62  ;;  %v902_v62 = vor.u32 %v1032_v59, %v901_v58  ;;  %v950_v59 = vor.u32 %v1044_v55, %v949_v54 }
  0xeb   :  { %v167_v0 = vpop.f32.mrf.mxu0 }
  0xec   :  { %v253_v7 = vpack.c.bf16 %v167_v0, %v165_v63  ;;  %v890_v63 = vor.u32 %v1027_v60, %v887_v61  ;;  %v973_v0 = vld [vmem:[%s1645_s2 + $0xe0] sm:$0xf]  ;;  %v634_v61 = vld [vmem:[%s1646_s3 + $0x8] sm:$0xff] }
  0xed   :  { %v974_v2 = vor.u32 %v1050_v1, %v973_v0  ;;  %v633_v60 = vld [vmem:[%s1646_s3] sm:$0xff] }
  0xf3   :  { %v170_v4 = vpop.f32.mrf.mxu0 }
  0xf6   :  { %858 = vmatmul.msk.bf16.gmra.mxu0 %vm73_vm1, %v71_v3  ;;  %v909_v3 = vld [vmem:[%s1645_s2 + $0x60] sm:$0xf] }
  0xfb   :  { %v172_v5 = vpop.f32.mrf.mxu0 }
  0xfc   :  { %v254_v6 = vpack.c.bf16 %v172_v5, %v170_v4  ;;  %v1034_v4 = vld [vmem:[%s1645_s2 + $0x64] sm:$0xf0]  ;;  %v1029_v5 = vld [vmem:[%s1645_s2 + $0x44] sm:$0xf] }
  0xfe   :  { %423 = vmatpush.bf16.msra.mxu1 %v254_v6  ;;  %1061 = vmatpush.bf16.msra.mxu3 %v254_v6  ;;  %v895_v6 = vld [vmem:[%s1645_s2 + $0x48] sm:$0xf0] }
 0x102   :  { %424 = vmatpush.bf16.msra.mxu1 %v253_v7  ;;  %1062 = vmatpush.bf16.msra.mxu3 %v253_v7  ;;  %v910_v7 = vor.u32 %v1034_v4, %v909_v3 }
 0x103   :  { %v175_v8 = vpop.f32.mrf.mxu0 }
 0x106   :  { %425 = vmatpush.bf16.msra.mxu1 %v252_v9  ;;  %1063 = vmatpush.bf16.msra.mxu3 %v252_v9  ;;  %v981_v9 = vld [vmem:[%s1645_s2 + $0xf0] sm:$0xf] }
 0x10a   :  { %426 = vmatpush.bf16.msra.mxu1 %v251_v10  ;;  %1064 = vmatpush.bf16.msra.mxu3 %v251_v10  ;;  %v1052_v10 = vld [vmem:[%s1645_s2 + $0xf4] sm:$0xf0] }
 0x10b   :  { %v177_v11 = vpop.f32.mrf.mxu0 }
 0x10c   :  { %v255_v12 = vpack.c.bf16 %v177_v11, %v175_v8  ;;  %v898_v8 = vor.u32 %v1029_v5, %v895_v6  ;;  %v982_v11 = vor.u32 %v1052_v10, %v981_v9  ;;  %v1041_v5 = vld [vmem:[%s1645_s2 + $0xa4] sm:$0xf]  ;;  %v943_v6 = vld [vmem:[%s1645_s2 + $0xa8] sm:$0xf0]  ;;  %v1046_v9 = vld [vmem:[%s1645_s2 + $0xc4] sm:$0xf0] }
 0x10e   :  { %427 = vmatpush.bf16.msra.mxu1 %v250_v49  ;;  %1065 = vmatpush.bf16.msra.mxu3 %v250_v49  ;;  %v871_v49 = vld [vmem:[%s1645_s2 + $0x18] sm:$0xf0] }
 0x10f   :  { %v874_v51 = vor.u32 %v1023_v48, %v871_v49 }
 0x112   :  { %428 = vmatpush.bf16.msra.mxu1 %v249_v43  ;;  %1066 = vmatpush.bf16.msra.mxu3 %v249_v43  ;;  %v863_v43 = vld [vmem:[%s1645_s2 + $0x8] sm:$0xf0] }
 0x113   :  { %v180_v13 = vpop.f32.mrf.mxu0  ;;  %v866_v45 = vor.u32 %v1021_v42, %v863_v43  ;;  %v941_v43 = vld [vmem:[%s1645_s2 + $0xa0] sm:$0xf] }
 0x116   :  { %429 = vmatpush.bf16.msra.mxu1 %v248_v37  ;;  %1067 = vmatpush.bf16.msra.mxu3 %v248_v37  ;;  %v1024_v37 = vld [vmem:[%s1645_s2 + $0x14] sm:$0xf0] }
 0x117   :  { %v870_v38 = vor.u32 %v1024_v37, %v869_v36  ;;  %v1040_v36 = vld [vmem:[%s1645_s2 + $0x94] sm:$0xf0] }
 0x11a   :  { %430 = vmatpush.bf16.msra.mxu1 %v1178_v31  ;;  %1068 = vmatpush.bf16.msra.mxu3 %v1178_v31  ;;  %v862_v31 = vor.u32 %v1022_v30, %v861_v29  ;;  %v1035_v29 = vld [vmem:[%s1645_s2 + $0x74] sm:$0xf]  ;;  %v919_v30 = vld [vmem:[%s1645_s2 + $0x78] sm:$0xf0] }
 0x11b   :  { %v182_v14 = vpop.f32.mrf.mxu0  ;;  %v922_v37 = vor.u32 %v1035_v29, %v919_v30 }
 0x11c   :  { %v256_v15 = vpack.c.bf16 %v182_v14, %v180_v13  ;;  %v1036_v13 = vld [vmem:[%s1645_s2 + $0x74] sm:$0xf0]  ;;  %v1031_v14 = vld [vmem:[%s1645_s2 + $0x54] sm:$0xf] }
 0x11d   :  { %431 = vmatmul.bf16.vlgmr.msra.gmra.mxu1 %v862_v31  ;;  %501 = vmatmul.bf16.vlgmr.msra.gmra.mxu3 %v974_v2  ;;  %v1051_v31 = vld [vmem:[%s1645_s2 + $0xf4] sm:$0xf] }
 0x123   :  { %v185_v16 = vpop.f32.mrf.mxu0 }
 0x12b   :  { %v187_v17 = vpop.f32.mrf.mxu0 }
 0x12c   :  { %v257_v18 = vpack.c.bf16 %v187_v17, %v185_v16 }
 0x12d   :  { %436 = vmatmul.bf16.gmra.mxu1 %v870_v38  ;;  %506 = vmatmul.bf16.gmra.mxu3 %v982_v11 }
 0x133   :  { %v190_v19 = vpop.f32.mrf.mxu0 }
 0x13b   :  { %v192_v20 = vpop.f32.mrf.mxu0 }
 0x13c   :  { %v258_v21 = vpack.c.bf16 %v192_v20, %v190_v19  ;;  %v975_v19 = vld [vmem:[%s1645_s2 + $0xe8] sm:$0xf0] }
 0x13d   :  { %441 = vmatmul.bf16.gmra.mxu1 %v878_v44  ;;  %v1042_v44 = vld [vmem:[%s1645_s2 + $0xa4] sm:$0xf0] }
 0x13e   :  { %v942_v46 = vor.u32 %v1042_v44, %v941_v43  ;;  %v959_v43 = vld [vmem:[%s1645_s2 + $0xc8] sm:$0xf0] }
 0x143   :  { %v195_v22 = vpop.f32.mrf.mxu0 }
 0x14b   :  { %v197_v23 = vpop.f32.mrf.mxu0 }
 0x14c   :  { %v259_v39 = vpack.c.bf16 %v197_v23, %v195_v22  ;;  %v1038_v22 = vld [vmem:[%s1645_s2 + $0x84] sm:$0xf0]  ;;  %v1033_v23 = vld [vmem:[%s1645_s2 + $0x64] sm:$0xf] }
 0x14d   :  { %446 = vmatmul.bf16.gmra.mxu1 %v886_v50  ;;  %v1039_v50 = vld [vmem:[%s1645_s2 + $0x94] sm:$0xf] }
 0x153   :  { %v200_v24 = vpop.f32.mrf.mxu0 }
 0x15b   :  { %v202_v25 = vpop.f32.mrf.mxu0 }
 0x15c   :  { %v260_v35 = vpack.c.bf16 %v202_v25, %v200_v24  ;;  %v911_v24 = vld [vmem:[%s1645_s2 + $0x68] sm:$0xf0] }
 0x15d   :  { %451 = vmatmul.bf16.gmra.mxu1 %v894_v56 }
 0x163   :  { %v205_v26 = vpop.f32.mrf.mxu0 }
 0x16b   :  { %v207_v27 = vpop.f32.mrf.mxu0 }
 0x16c   :  { %v261_v34 = vpack.c.bf16 %v207_v27, %v205_v26  ;;  %v914_v27 = vor.u32 %v1033_v23, %v911_v24  ;;  %v1043_v24 = vld [vmem:[%s1645_s2 + $0xb4] sm:$0xf] }
 0x16d   :  { %456 = vmatmul.bf16.gmra.mxu1 %v902_v62 }
 0x173   :  { %v210_v28 = vpop.f32.mrf.mxu0 }
 0x17b   :  { %v212_v32 = vpop.f32.mrf.mxu0 }
 0x17c   :  { %v262_v33 = vpack.c.bf16 %v212_v32, %v210_v28  ;;  %v983_v32 = vld [vmem:[%s1645_s2 + $0xf8] sm:$0xf0] }
 0x17d   :  { %461 = vmatmul.bf16.gmra.mxu1 %v910_v7 }
 0x17e   :  { %512 = vmatpush.bf16.msra.mxu2 %v262_v33  ;;  %1069 = vmatpush.bf16.msrb.mxu3 %v262_v33 }
 0x182   :  { %513 = vmatpush.bf16.msra.mxu2 %v261_v34  ;;  %1070 = vmatpush.bf16.msrb.mxu3 %v261_v34  ;;  %v986_v34 = vor.u32 %v1051_v31, %v983_v32 }
 0x186   :  { %514 = vmatpush.bf16.msra.mxu2 %v260_v35  ;;  %1071 = vmatpush.bf16.msrb.mxu3 %v260_v35  ;;  %v933_v35 = vld [vmem:[%s1645_s2 + $0x90] sm:$0xf] }
 0x187   :  { %v934_v38 = vor.u32 %v1040_v36, %v933_v35 }
 0x18a   :  { %515 = vmatpush.bf16.msra.mxu2 %v259_v39  ;;  %1072 = vmatpush.bf16.msrb.mxu3 %v259_v39 }
 0x18e   :  { %516 = vmatpush.bf16.msra.mxu2 %v258_v21  ;;  %1073 = vmatpush.bf16.msrb.mxu3 %v258_v21  ;;  %v925_v21 = vld [vmem:[%s1645_s2 + $0x80] sm:$0xf] }
 0x18f   :  { %v926_v25 = vor.u32 %v1038_v22, %v925_v21 }
 0x192   :  { %517 = vmatpush.bf16.msra.mxu2 %v257_v18  ;;  %1074 = vmatpush.bf16.msrb.mxu3 %v257_v18  ;;  %v1049_v18 = vld [vmem:[%s1645_s2 + $0xe4] sm:$0xf] }
 0x193   :  { %v978_v20 = vor.u32 %v1049_v18, %v975_v19 }
 0x196   :  { %518 = vmatpush.bf16.msra.mxu2 %v256_v15  ;;  %1075 = vmatpush.bf16.msrb.mxu3 %v256_v15  ;;  %v903_v15 = vld [vmem:[%s1645_s2 + $0x58] sm:$0xf0] }
 0x197   :  { %v906_v17 = vor.u32 %v1031_v14, %v903_v15  ;;  %v635_v14 = vld [vmem:[%s1646_s3 + $0x10] sm:$0xff]  ;;  %v636_v15 = vld [vmem:[%s1646_s3 + $0x18] sm:$0xff] }
 0x19a   :  { %519 = vmatpush.bf16.msra.mxu2 %v255_v12  ;;  %1076 = vmatpush.bf16.msrb.mxu3 %v255_v12  ;;  %v917_v12 = vld [vmem:[%s1645_s2 + $0x70] sm:$0xf]  ;;  %v432_v26 = vpop.f32.mrf.mxu1 }
 0x19b   :  { %v918_v16 = vor.u32 %v1036_v13, %v917_v12  ;;  %v946_v12 = vor.u32 %v1041_v5, %v943_v6 }
 0x19d   :  { %520 = vmatmul.bf16.vlgmr.msra.gmra.mxu2 %v866_v45  ;;  %466 = vmatmul.bf16.gmra.mxu1 %v918_v16  ;;  %v930_v45 = vor.u32 %v1037_v40, %v927_v41 }
 0x19e   :  { %590 = vmatmul.bf16.vlgmr.msrb.gmra.mxu3 %v978_v20 }
 0x1a2   :  { %v434_v28 = vpop.f32.mrf.mxu1 }
 0x1aa   :  { %v437_v33 = vpop.f32.mrf.mxu1 }
 0x1ad   :  { %525 = vmatmul.bf16.gmra.mxu2 %v874_v51  ;;  %471 = vmatmul.bf16.gmra.mxu1 %v926_v25  ;;  %v935_v51 = vld [vmem:[%s1645_s2 + $0x98] sm:$0xf0] }
 0x1ae   :  { %595 = vmatmul.bf16.gmra.mxu3 %v986_v34  ;;  %v938_v58 = vor.u32 %v1039_v50, %v935_v51  ;;  %v951_v25 = vld [vmem:[%s1645_s2 + $0xb8] sm:$0xf0]  ;;  %v638_v34 = vld [vmem:[%s1646_s3 + $0x28] sm:$0xff] }
 0x1af   :  { %v954_v31 = vor.u32 %v1043_v24, %v951_v25  ;;  %v640_v50 = vld [vmem:[%s1646_s3 + $0x38] sm:$0xff] }
 0x1b2   :  { %v439_v39 = vpop.f32.mrf.mxu1 }
 0x1ba   :  { %v442_v42 = vpop.f32.mrf.mxu1 }
 0x1bd   :  { %530 = vmatmul.bf16.gmra.mxu2 %v882_v57  ;;  %476 = vmatmul.bf16.gmra.mxu1 %v934_v38 }
 0x1c2   :  { %v444_v48 = vpop.f32.mrf.mxu1 }
 0x1ca   :  { %v447_v53 = vpop.f32.mrf.mxu1 }
 0x1cd   :  { %535 = vmatmul.bf16.gmra.mxu2 %v890_v63  ;;  %481 = vmatmul.bf16.gmra.mxu1 %v942_v46 }
 0x1d2   :  { %v449_v3 = vpop.f32.mrf.mxu1 }
 0x1da   :  { %v452_v16 = vpop.f32.mrf.mxu1 }
 0x1dd   :  { %540 = vmatmul.bf16.gmra.mxu2 %v898_v8  ;;  %486 = vmatmul.bf16.gmra.mxu1 %v950_v59  ;;  %v957_v8 = vld [vmem:[%s1645_s2 + $0xc0] sm:$0xf]  ;;  %v1047_v59 = vld [vmem:[%s1645_s2 + $0xd4] sm:$0xf] }
 0x1de   :  { %v958_v13 = vor.u32 %v1046_v9, %v957_v8 }
 0x1e2   :  { %v1423_v23 = vpop.f32.mrf.mxu1 }
 0x1ea   :  { %v457_v38 = vpop.f32.mrf.mxu1 }
 0x1ed   :  { %545 = vmatmul.bf16.gmra.mxu2 %v906_v17  ;;  %491 = vmatmul.bf16.gmra.mxu1 %v958_v13 }
 0x1fd   :  { %550 = vmatmul.bf16.gmra.mxu2 %v914_v27  ;;  %v965_v27 = vld [vmem:[%s1645_s2 + $0xd0] sm:$0xf] }
 0x20d   :  { %555 = vmatmul.bf16.gmra.mxu2 %v922_v37 }
 0x21d   :  { %560 = vmatmul.bf16.gmra.mxu2 %v930_v45  ;;  %v459_v45 = vpop.f32.mrf.mxu1 }
 0x220   :  { %v521_v47 = vpop.f32.mrf.mxu2 }
 0x221   :  { %v522_v49 = vadd.f32 %v521_v47, %v432_v26 }
 0x223   :  { %v601_v56 = vmax.f32 %v522_v49, 0.0  ;;  %v639_v49 = vld [vmem:[%s1646_s3 + $0x30] sm:$0xff] }
 0x225   :  { %v1393_v63 = vmul.f32 %v633_v60, %v601_v56  ;;  %v967_v60 = vld [vmem:[%s1645_s2 + $0xd8] sm:$0xf0] }
 0x228   :  { %v523_v52 = vpop.f32.mrf.mxu2 }
 0x229   :  { %v524_v57 = vadd.f32 %v523_v52, %v434_v28  ;;  %v1048_v28 = vld [vmem:[%s1645_s2 + $0xd4] sm:$0xf0] }
 0x22a   :  { %v966_v32 = vor.u32 %v1048_v28, %v965_v27  ;;  %v647_v27 = vld [vmem:[%s1646_s3 + $0x70] sm:$0xff]  ;;  %v648_v28 = vld [vmem:[%s1646_s3 + $0x78] sm:$0xff] }
 0x22b   :  { %v602_v62 = vmax.f32 %v524_v57, 0.0  ;;  %v462_v57 = vpop.f32.mrf.mxu1 }
 0x22c   :  { %496 = vmatmul.bf16.gmra.mxu1 %v966_v32  ;;  %v646_v32 = vld [vmem:[%s1646_s3 + $0x68] sm:$0xff] }
 0x22d   :  { %v1395_v0 = vmul.f32 %v634_v61, %v602_v62  ;;  %565 = vmatmul.bf16.gmra.mxu2 %v938_v58  ;;  %v1469_v58 = vpop.f32.mrf.mxu3  ;;  %v970_v62 = vor.u32 %v1047_v59, %v967_v60  ;;  %v642_v60 = vld [vmem:[%s1646_s3 + $0x48] sm:$0xff] }
 0x22f   :  { %v701_v1 = vpack.c.bf16 %v1395_v0, %v1393_v63 }
 0x230   :  { %v526_v2 = vpop.f32.mrf.mxu2 }
 0x231   :  { %v527_v4 = vadd.f32 %v526_v2, %v437_v33  ;;  %v637_v33 = vld [vmem:[%s1646_s3 + $0x20] sm:$0xff] }
 0x233   :  { %v603_v10 = vmax.f32 %v527_v4, 0.0  ;;  %v464_v2 = vpop.f32.mrf.mxu1 }
 0x235   :  { %v1417_v18 = vmul.f32 %v635_v14, %v603_v10 }
 0x238   :  { %v528_v7 = vpop.f32.mrf.mxu2 }
 0x239   :  { %v529_v11 = vadd.f32 %v528_v7, %v439_v39 }
 0x23b   :  { %v604_v17 = vmax.f32 %v529_v11, 0.0  ;;  %v467_v5 = vpop.f32.mrf.mxu1 }
 0x23d   :  { %v1419_v19 = vmul.f32 %v636_v15, %v604_v17  ;;  %570 = vmatmul.bf16.gmra.mxu2 %v946_v12 }
 0x23f   :  { %v702_v20 = vpack.c.bf16 %v1419_v19, %v1417_v18 }
 0x240   :  { %v531_v21 = vpop.f32.mrf.mxu2 }
 0x241   :  { %v532_v22 = vadd.f32 %v531_v21, %v442_v42  ;;  %v1045_v42 = vld [vmem:[%s1645_s2 + $0xc4] sm:$0xf] }
 0x243   :  { %v605_v29 = vmax.f32 %v532_v22, 0.0  ;;  %v469_v9 = vpop.f32.mrf.mxu1 }
 0x245   :  { %v1443_v36 = vmul.f32 %v637_v33, %v605_v29 }
 0x248   :  { %v533_v26 = vpop.f32.mrf.mxu2 }
 0x249   :  { %v534_v30 = vadd.f32 %v533_v26, %v444_v48  ;;  %v962_v48 = vor.u32 %v1045_v42, %v959_v43 }
 0x24b   :  { %v606_v35 = vmax.f32 %v534_v30, 0.0  ;;  %v472_v12 = vpop.f32.mrf.mxu1 }
 0x24d   :  { %v1445_v37 = vmul.f32 %v638_v34, %v606_v35  ;;  %575 = vmatmul.bf16.gmra.mxu2 %v954_v31 }
 0x24f   :  { %v703_v39 = vpack.c.bf16 %v1445_v37, %v1443_v36 }
 0x250   :  { %v536_v40 = vpop.f32.mrf.mxu2 }
 0x251   :  { %v537_v41 = vadd.f32 %v536_v40, %v447_v53 }
 0x253   :  { %v607_v46 = vmax.f32 %v537_v41, 0.0  ;;  %v474_v15 = vpop.f32.mrf.mxu1  ;;  %v645_v41 = vld [vmem:[%s1646_s3 + $0x60] sm:$0xff] }
 0x255   :  { %v1461_v52 = vmul.f32 %v639_v49, %v607_v46 }
 0x258   :  { %v538_v44 = vpop.f32.mrf.mxu2 }
 0x259   :  { %v539_v47 = vadd.f32 %v538_v44, %v449_v3  ;;  %v1477_v3 = vpop.f32.mrf.mxu3 }
 0x25b   :  { %v608_v51 = vmax.f32 %v539_v47, 0.0  ;;  %v477_v42 = vpop.f32.mrf.mxu1  ;;  %v644_v47 = vld [vmem:[%s1646_s3 + $0x58] sm:$0xff] }
 0x25d   :  { %v1463_v53 = vmul.f32 %v640_v50, %v608_v51  ;;  %580 = vmatmul.bf16.gmra.mxu2 %v962_v48 }
 0x25f   :  { %v704_v54 = vpack.c.bf16 %v1463_v53, %v1461_v52 }
 0x260   :  { %v541_v55 = vpop.f32.mrf.mxu2 }
 0x261   :  { %v1467_v56 = vadd.f32 %v541_v55, %v452_v16  ;;  %v1479_v7 = vpop.f32.mrf.mxu3  ;;  %v643_v55 = vld [vmem:[%s1646_s3 + $0x50] sm:$0xff] }
 0x268   :  { %v543_v61 = vpop.f32.mrf.mxu2 }
 0x269   :  { %v509_v10 = vpop.f32.mrf.mxu3  ;;  %v544_v43 = vadd.f32 %v543_v61, %v1423_v23  ;;  %v609_v61 = vmax.f32 %v1467_v56, 0.0  ;;  %v650_v56 = vld [vmem:[%s1646_s3 + $0x88] sm:$0xff] }
 0x26d   :  { %585 = vmatmul.bf16.gmra.mxu2 %v970_v62 }
 0x270   :  { %v546_v4 = vpop.f32.mrf.mxu2 }
 0x271   :  { %v1481_v13 = vpop.f32.mrf.mxu3  ;;  %v547_v33 = vadd.f32 %v546_v4, %v457_v38 }
 0x273   :  { %v611_v49 = vmax.f32 %v547_v33, 0.0 }
 0x275   :  { %v675_v62 = vmul.f32 %v643_v55, %v611_v49 }
 0x278   :  { %v548_v6 = vpop.f32.mrf.mxu2 }
 0x279   :  { %v593_v21 = vpop.f32.mrf.mxu3  ;;  %v549_v29 = vadd.f32 %v548_v6, %v459_v45 }
 0x27b   :  { %v612_v44 = vmax.f32 %v549_v29, 0.0 }
 0x27d   :  { %v676_v59 = vmul.f32 %v644_v47, %v612_v44 }
 0x280   :  { %v551_v8 = vpop.f32.mrf.mxu2 }
 0x281   :  { %v552_v24 = vadd.f32 %v551_v8, %v462_v57  ;;  %v596_v51 = vpop.f32.mrf.mxu3  ;;  %v610_v57 = vmax.f32 %v544_v43, 0.0  ;;  %v479_v8 = vpop.f32.mrf.mxu1 }
 0x283   :  { %v613_v34 = vmax.f32 %v552_v24, 0.0  ;;  %v674_v4 = vmul.f32 %v642_v60, %v610_v57  ;;  %v997_v57 = vld [vmem:[%s1647_s4 + $0x10] sm:$0xf] }
 0x285   :  { %v677_v38 = vmul.f32 %v645_v41, %v613_v34 }
 0x288   :  { %v553_v11 = vpop.f32.mrf.mxu2 }
 0x289   :  { %v554_v17 = vadd.f32 %v553_v11, %v464_v2  ;;  %v641_v2 = vld [vmem:[%s1646_s3 + $0x40] sm:$0xff]  ;;  %v482_v34 = vpop.f32.mrf.mxu1 }
 0x28b   :  { %v614_v30 = vmax.f32 %v554_v17, 0.0 }
 0x28d   :  { %v678_v46 = vmul.f32 %v646_v32, %v614_v30  ;;  %v592_v30 = vadd.f32 %v1481_v13, %v1469_v58  ;;  %v662_v13 = vld [vmem:[%s1646_s3 + $0xe8] sm:$0xff] }
 0x28f   :  { %v707_v23 = vpack.c.bf16 %v678_v46, %v677_v38  ;;  %v629_v52 = vmax.f32 %v592_v30, 0.0  ;;  %v989_v38 = vld [vmem:[%s1647_s4] sm:$0xf] }
 0x290   :  { %v556_v14 = vpop.f32.mrf.mxu2 }
 0x291   :  { %v557_v16 = vadd.f32 %v556_v14, %v467_v5  ;;  %v706_v5 = vpack.c.bf16 %v676_v59, %v675_v62  ;;  %v649_v14 = vld [vmem:[%s1646_s3 + $0x80] sm:$0xff]  ;;  %v484_v44 = vpop.f32.mrf.mxu1  ;;  %v1056_v59 = vld [vmem:[%s1647_s4 + $0x14] sm:$0xf0] }
 0x293   :  { %v615_v25 = vmax.f32 %v557_v16, 0.0 }
 0x295   :  { %v679_v35 = vmul.f32 %v647_v27, %v615_v25 }
 0x298   :  { %v558_v22 = vpop.f32.mrf.mxu2 }
 0x299   :  { %v559_v26 = vadd.f32 %v558_v22, %v469_v9  ;;  %v673_v9 = vmul.f32 %v641_v2, %v609_v61  ;;  %v598_v22 = vpop.f32.mrf.mxu3 }
 0x29b   :  { %v616_v31 = vmax.f32 %v559_v26, 0.0  ;;  %v705_v17 = vpack.c.bf16 %v674_v4, %v673_v9  ;;  %v597_v26 = vadd.f32 %v596_v51, %v1479_v7  ;;  %v663_v7 = vld [vmem:[%s1646_s3 + $0xf0] sm:$0xff] }
 0x29d   :  { %v680_v40 = vmul.f32 %v648_v28, %v616_v31  ;;  %v594_v31 = vadd.f32 %v593_v21, %v1477_v3  ;;  %v631_v32 = vmax.f32 %v597_v26, 0.0  ;;  %v661_v3 = vld [vmem:[%s1646_s3 + $0xe0] sm:$0xff] }
 0x29e   :  { %v693_v36 = vmul.f32 %v661_v3, %v629_v52  ;;  %v656_v52 = vld [vmem:[%s1646_s3 + $0xb8] sm:$0xff] }
 0x29f   :  { %v708_v45 = vpack.c.bf16 %v680_v40, %v679_v35  ;;  %v630_v53 = vmax.f32 %v594_v31, 0.0 }
 0x2a0   :  { %v561_v48 = vpop.f32.mrf.mxu2 }
 0x2a1   :  { %v562_v50 = vadd.f32 %v561_v48, %v472_v12  ;;  %737 = vmatpush.bf16.msra.mxu3 %v708_v45  ;;  %v694_v37 = vmul.f32 %v662_v13, %v630_v53  ;;  %v487_v48 = vpop.f32.mrf.mxu1 }
 0x2a3   :  { %v617_v11 = vmax.f32 %v562_v50, 0.0  ;;  %v715_v18 = vpack.c.bf16 %v694_v37, %v693_v36  ;;  %v1054_v50 = vld [vmem:[%s1647_s4 + $0x4] sm:$0xf0]  ;;  %v653_v37 = vld [vmem:[%s1646_s3 + $0xa0] sm:$0xff] }
 0x2a4   :  { %v990_v63 = vor.u32 %v1054_v50, %v989_v38 }
 0x2a5   :  { %738 = vmatpush.bf16.msra.mxu3 %v707_v23  ;;  %v1515_v24 = vmul.f32 %v649_v14, %v617_v11  ;;  %v998_v23 = vor.u32 %v1056_v59, %v997_v57 }
 0x2a8   :  { %v563_v6 = vpop.f32.mrf.mxu2 }
 0x2a9   :  { %v564_v12 = vadd.f32 %v563_v6, %v474_v15  ;;  %739 = vmatpush.bf16.msra.mxu3 %v706_v5  ;;  %v599_v15 = vadd.f32 %v598_v22, %v509_v10  ;;  %v664_v10 = vld [vmem:[%s1646_s3 + $0xf8] sm:$0xff]  ;;  %v489_v0 = vpop.f32.mrf.mxu1 }
 0x2ab   :  { %v618_v16 = vmax.f32 %v564_v12, 0.0  ;;  %v632_v33 = vmax.f32 %v599_v15, 0.0  ;;  %v658_v15 = vld [vmem:[%s1646_s3 + $0xc8] sm:$0xff] }
 0x2ad   :  { %v1517_v25 = vmul.f32 %v650_v56, %v618_v16  ;;  %740 = vmatpush.bf16.msra.mxu3 %v705_v17  ;;  %v696_v58 = vmul.f32 %v664_v10, %v632_v33  ;;  %v659_v56 = vld [vmem:[%s1646_s3 + $0xd0] sm:$0xff]  ;;  %v660_v16 = vld [vmem:[%s1646_s3 + $0xd8] sm:$0xff] }
 0x2af   :  { %v709_v27 = vpack.c.bf16 %v1517_v25, %v1515_v24  ;;  %v1059_v24 = vld [vmem:[%s1648_s5 + $0x10] sm:$0xff]  ;;  %v1058_v25 = vld [vmem:[%s1648_s5 + $0x8] sm:$0xff] }
 0x2b0   :  { %v566_v28 = vpop.f32.mrf.mxu2 }
 0x2b1   :  { %v567_v29 = vadd.f32 %v566_v28, %v477_v42  ;;  %741 = vmatpush.bf16.msra.mxu3 %v704_v54  ;;  %v695_v54 = vmul.f32 %v663_v7, %v631_v32  ;;  %v652_v42 = vld [vmem:[%s1646_s3 + $0x98] sm:$0xff]  ;;  %v492_v55 = vpop.f32.mrf.mxu1  ;;  %v657_v32 = vld [vmem:[%s1646_s3 + $0xc0] sm:$0xff] }
 0x2b3   :  { %v619_v35 = vmax.f32 %v567_v29, 0.0  ;;  %v716_v41 = vpack.c.bf16 %v696_v58, %v695_v54  ;;  %v655_v58 = vld [vmem:[%s1646_s3 + $0xb0] sm:$0xff] }
 0x2b5   :  { %742 = vmatpush.bf16.msra.mxu3 %v703_v39  ;;  %v651_v39 = vld [vmem:[%s1646_s3 + $0x90] sm:$0xff] }
 0x2b6   :  { %v1552_v46 = vmul.f32 %v651_v39, %v619_v35  ;;  %v654_v35 = vld [vmem:[%s1646_s3 + $0xa8] sm:$0xff] }
 0x2b8   :  { %v568_v21 = vpop.f32.mrf.mxu2 }
 0x2b9   :  { %v569_v40 = vadd.f32 %v568_v21, %v479_v8  ;;  %743 = vmatpush.bf16.msra.mxu3 %v702_v20  ;;  %v494_v61 = vpop.f32.mrf.mxu1 }
 0x2bb   :  { %v620_v43 = vmax.f32 %v569_v40, 0.0 }
 0x2bd   :  { %v1554_v45 = vmul.f32 %v652_v42, %v620_v43  ;;  %744 = vmatpush.bf16.msra.mxu3 %v701_v1 }
 0x2bf   :  { %v710_v19 = vpack.c.bf16 %v1554_v45, %v1552_v46  ;;  %v999_v46 = vld [vmem:[%s1647_s4 + $0x18] sm:$0xf0] }
 0x2c0   :  { %v571_v20 = vpop.f32.mrf.mxu2  ;;  %745 = vmatmul.bf16.vlgmr.msra.gmra.mxu3 %v990_v63 }
 0x2c1   :  { %756 = vmatpush.bf16.msrb.mxu3 %v716_v41  ;;  %v572_v47 = vadd.f32 %v571_v20, %v482_v34  ;;  %v497_v2 = vpop.f32.mrf.mxu1 }
 0x2c3   :  { %v621_v40 = vmax.f32 %v572_v47, 0.0  ;;  %v1055_v47 = vld [vmem:[%s1647_s4 + $0x14] sm:$0xf] }
 0x2c4   :  { %v1002_v45 = vor.u32 %v1055_v47, %v999_v46 }
 0x2c5   :  { %757 = vmatpush.bf16.msrb.mxu3 %v715_v18  ;;  %v685_v42 = vmul.f32 %v653_v37, %v621_v40  ;;  %v991_v18 = vld [vmem:[%s1647_s4 + $0x8] sm:$0xf0] }
 0x2c8   :  { %v573_v49 = vpop.f32.mrf.mxu2 }
 0x2c9   :  { %v499_v8 = vpop.f32.mrf.mxu1  ;;  %v574_v33 = vadd.f32 %v573_v49, %v484_v44  ;;  %v1053_v44 = vld [vmem:[%s1647_s4 + $0x4] sm:$0xf] }
 0x2ca   :  { %v994_v20 = vor.u32 %v1053_v44, %v991_v18 }
 0x2cb   :  { %v622_v3 = vmax.f32 %v574_v33, 0.0 }
 0x2cd   :  { %v686_v39 = vmul.f32 %v654_v35, %v622_v3 }
 0x2cf   :  { %v711_v43 = vpack.c.bf16 %v686_v39, %v685_v42 }
 0x2d0   :  { %v576_v1 = vpop.f32.mrf.mxu2  ;;  %750 = vmatmul.bf16.gmra.mxu3 %v998_v23 }
 0x2d1   :  { %v577_v28 = vadd.f32 %v576_v1, %v487_v48  ;;  %v1057_v48 = vld [vmem:[%s1648_s5] sm:$0xff] }
 0x2d3   :  { %v623_v53 = vmax.f32 %v577_v28, 0.0 }
 0x2d5   :  { %v687_v36 = vmul.f32 %v655_v58, %v623_v53 }
 0x2d8   :  { %v578_v51 = vpop.f32.mrf.mxu2 }
 0x2d9   :  { %v579_v17 = vadd.f32 %v578_v51, %v489_v0 }
 0x2db   :  { %v624_v34 = vmax.f32 %v579_v17, 0.0 }
 0x2dd   :  { %v688_v13 = vmul.f32 %v656_v52, %v624_v34 }
 0x2df   :  { %v712_v41 = vpack.c.bf16 %v688_v13, %v687_v36 }
 0x2e0   :  { %v581_v60 = vpop.f32.mrf.mxu2 }
 0x2e1   :  { %v582_v11 = vadd.f32 %v581_v60, %v492_v55 }
 0x2e3   :  { %v625_v29 = vmax.f32 %v582_v11, 0.0 }
 0x2e5   :  { %v689_v54 = vmul.f32 %v657_v32, %v625_v29 }
 0x2e8   :  { %v583_v62 = vpop.f32.mrf.mxu2 }
 0x2e9   :  { %v584_v6 = vadd.f32 %v583_v62, %v494_v61 }
 0x2eb   :  { %v626_v22 = vmax.f32 %v584_v6, 0.0 }
 0x2ed   :  { %v690_v7 = vmul.f32 %v658_v15, %v626_v22 }
 0x2ef   :  { %v713_v21 = vpack.c.bf16 %v690_v7, %v689_v54 }
 0x2f0   :  { %v586_v4 = vpop.f32.mrf.mxu2 }
 0x2f1   :  { %v587_v5 = vadd.f32 %v586_v4, %v497_v2 }
 0x2f3   :  { %v627_v12 = vmax.f32 %v587_v5, 0.0 }
 0x2f5   :  { %v691_v30 = vmul.f32 %v659_v56, %v627_v12 }
 0x2f8   :  { %v588_v9 = vpop.f32.mrf.mxu2 }
 0x2f9   :  { %v589_v14 = vadd.f32 %v588_v9, %v499_v8 }
 0x2fb   :  { %v628_v26 = vmax.f32 %v589_v14, 0.0 }
 0x2fd   :  { %v692_v31 = vmul.f32 %v660_v16, %v628_v26 }
 0x2ff   :  { %v714_v10 = vpack.c.bf16 %v692_v31, %v691_v30 }
 0x301   :  { %758 = vmatpush.bf16.msrb.mxu3 %v714_v10 }
 0x305   :  { %759 = vmatpush.bf16.msrb.mxu3 %v713_v21 }
 0x309   :  { %760 = vmatpush.bf16.msrb.mxu3 %v712_v41 }
 0x30d   :  { %761 = vmatpush.bf16.msrb.mxu3 %v711_v43 }
 0x311   :  { %762 = vmatpush.bf16.msrb.mxu3 %v710_v19  ;;  %v1060_v19 = vld [vmem:[%s1648_s5 + $0x18] sm:$0xff] }
 0x315   :  { %763 = vmatpush.bf16.msrb.mxu3 %v709_v27 }
 0x318   :  { %764 = vmatmul.bf16.vlgmr.msrb.gmra.mxu3 %v994_v20 }
 0x319   :  { %820 = vmatpush.bf16.msra.mxu3 %v1060_v19 }
 0x31d   :  { %821 = vmatpush.bf16.msra.mxu3 %v1059_v24 }
 0x321   :  { %822 = vmatpush.bf16.msra.mxu3 %v1058_v25 }
 0x325   :  { %823 = vmatpush.bf16.msra.mxu3 %v1057_v48 }
 0x328   :  { %769 = vmatmul.bf16.gmra.mxu3 %v1002_v45 }
 0x343   :  { %v746_v27 = vpop.f32.mrf.mxu3 }
 0x34b   :  { %v748_v49 = vpop.f32.mrf.mxu3 }
 0x353   :  { %v751_v38 = vpop.f32.mrf.mxu3 }
 0x35b   :  { %v753_v50 = vpop.f32.mrf.mxu3 }
 0x39b   :  { %v765_v63 = vpop.f32.mrf.mxu3 }
 0x39c   :  { %v766_v1 = vadd.f32 %v765_v63, %v746_v27 }
 0x3a3   :  { %v767_v0 = vpop.f32.mrf.mxu3 }
 0x3a4   :  { %v768_v51 = vadd.f32 %v767_v0, %v748_v49 }
 0x3a6   :  { %v775_v55 = vpack.c.bf16 %v768_v51, %v766_v1 }
 0x3a8   :  { %1019 = vmatmul.msk.bf16.vlgmr.msra.gmra.mxu3 %vm809_vm2, %v775_v55 }
 0x3ab   :  { %v770_v57 = vpop.f32.mrf.mxu3 }
 0x3ac   :  { %v771_v23 = vadd.f32 %v770_v57, %v751_v38 }
 0x3b3   :  { %v772_v59 = vpop.f32.mrf.mxu3 }
 0x3b4   :  { %v773_v60 = vadd.f32 %v772_v59, %v753_v50 }
 0x3b6   :  { %v776_v61 = vpack.c.bf16 %v773_v60, %v771_v23 }
 0x3b8   :  { %1020 = vmatmul.msk.bf16.gmra.mxu3 %vm809_vm2, %v776_v61 }
 0x42b   :  { %v825_v62 = vpop.f32.mrf.mxu3 }
 0x42c   :  { %835 = vst.msk [vmem:[%s1649_s6] sm:$0xff] %vm73_vm1, %v825_v62 }
 0x433   :  { %v827_v2 = vpop.f32.mrf.mxu3 }
 0x434   :  { %836 = vst.msk [vmem:[%s1649_s6 + $0x8] sm:$0xff] %vm73_vm1, %v827_v2 }
 0x43b   :  { %v830_v4 = vpop.f32.mrf.mxu3 }
 0x43c   :  { %837 = vst.msk [vmem:[%s1649_s6 + $0x10] sm:$0xff] %vm73_vm1, %v830_v4 }
 0x443   :  { %v832_v5 = vpop.f32.mrf.mxu3 }
 0x444   :  { %838 = vst.msk [vmem:[%s1649_s6 + $0x18] sm:$0xff] %vm73_vm1, %v832_v5 }

</bundles_post_ra>
